<compile_context>
chip_gen: v7x
topology: tpu7x:2x2x1
jax: 0.10.0
libtpu: 0.0.40
codegen_flags: <defaults>
</compile_context>

<pallas_src>
import functools
import math

import jax
import jax.numpy as jnp
import numpy as np
from jax import lax
from jax.experimental import pallas as pl
from jax.experimental.pallas import tpu as pltpu


def _qkv_proj_kernel(q_ref, k_ref, v_ref,
                     wq_ref, wk_ref, wv_ref,
                     bq_ref, bk_ref, bv_ref,
                     qh_ref, kh_ref, vh_ref,
                     *, num_heads, depth, scale):
    """Per-batch fused QKV projection; emits head-major bf16 Q(scaled)/K/V."""

    def proj(x_ref, w_ref, b_ref):
        x = x_ref[0].astype(jnp.bfloat16)                      # (S, D)
        y = jnp.dot(x, w_ref[...], preferred_element_type=jnp.float32)
        return y + b_ref[...]                                  # (S, D) f32

    Q = proj(q_ref, wq_ref, bq_ref) * scale   # fold 1/sqrt(depth) in once
    K = proj(k_ref, wk_ref, bk_ref)
    V = proj(v_ref, wv_ref, bv_ref)

    # Head-split relayout happens once per batch step, off the attention hot
    # path; downstream kernels read contiguous (S, depth) head tiles.
    for h in range(num_heads):
        lo = h * depth
        qh_ref[0, h] = Q[:, lo:lo + depth].astype(jnp.bfloat16)
        kh_ref[0, h] = K[:, lo:lo + depth].astype(jnp.bfloat16)
        vh_ref[0, h] = V[:, lo:lo + depth].astype(jnp.bfloat16)


def _attn_kernel(qh_ref, kh_ref, vh_ref, mask_ref, wo_ref, bo_ref,
                 out_ref, attn_ref):
    """Per-(batch, head) attention + output projection accumulated over heads."""
    h = pl.program_id(1)

    qh = qh_ref[0, 0]                                          # (S, depth) bf16 (pre-scaled)
    kh = kh_ref[0, 0]                                          # (S, depth) bf16
    vh = vh_ref[0, 0]                                          # (S, depth) bf16

    # logits = Q K^T: contract on the last dims, no explicit transpose.
    logits = lax.dot_general(qh, kh, (((1,), (1,)), ((), ())),
                             preferred_element_type=jnp.float32)   # (S, S) f32

    # Mask scaled once (compact (1, S) padding mask broadcasts over queries;
    # a full (S, S) mask is added elementwise).
    neg_mask = mask_ref[0, 0] * (-1e9)
    logits = logits + neg_mask

    # Numerically stable softmax in f32; EUP reciprocal instead of a divide.
    logits = logits - jnp.max(logits, axis=-1, keepdims=True)
    e = jnp.exp(logits)
    w = e * pl.reciprocal(jnp.sum(e, axis=-1, keepdims=True), approx=True)

    attn_ref[0, 0] = w

    head_out = jnp.dot(w.astype(jnp.bfloat16), vh,
                       preferred_element_type=jnp.float32)     # (S, depth) f32
    # Per-head slice of the output projection: concat(heads) @ Wo
    # == sum_h head_h @ Wo[h*depth:(h+1)*depth, :], accumulated over the
    # "arbitrary" head grid axis into the resident (S, D) output block.
    contrib = jnp.dot(head_out.astype(jnp.bfloat16), wo_ref[0],
                      preferred_element_type=jnp.float32)      # (S, D) f32

    @pl.when(h == 0)
    def _():
        out_ref[0] = contrib + bo_ref[...]

    @pl.when(h != 0)
    def _():
        out_ref[0] = out_ref[0] + contrib


def multi_head_attention(q, k, v, mask, params, *, num_heads):
    """q, k, v: (B, S, D) f32; mask: (B, 1, 1, S) or (B, 1, S, S) f32 (1 = masked)."""
    B, S, D = q.shape
    depth = D // num_heads
    scale = 1.0 / math.sqrt(float(depth))
    wq, bq, wk, bk, wv, bv, wo, bo = params

    # bf16 weights for the MXU; biases stay f32 (added after f32 accumulation).
    wq_b = wq.astype(jnp.bfloat16)
    wk_b = wk.astype(jnp.bfloat16)
    wv_b = wv.astype(jnp.bfloat16)
    wo_h = wo.reshape(num_heads, depth, D).astype(jnp.bfloat16)

    Mq = mask.shape[2]   # 1 for a compact key-padding mask, S for a full mask

    # ---- Kernel 1: fused QKV projection (grid over batch) -------------------
    qkv_spec = pl.BlockSpec((1, S, D), lambda b: (b, 0, 0))
    w_spec = pl.BlockSpec((D, D), lambda b: (0, 0))
    b_spec = pl.BlockSpec((1, D), lambda b: (0, 0))
    head_out_spec = pl.BlockSpec((1, num_heads, S, depth), lambda b: (b, 0, 0, 0))

    proj_kernel = functools.partial(_qkv_proj_kernel, num_heads=num_heads,
                                    depth=depth, scale=scale)
    head_shape = jax.ShapeDtypeStruct((B, num_heads, S, depth), jnp.bfloat16)
    qh, kh, vh = pl.pallas_call(
        proj_kernel,
        out_shape=(head_shape, head_shape, head_shape),
        grid_spec=pltpu.PrefetchScalarGridSpec(
            num_scalar_prefetch=0,
            grid=(B,),
            in_specs=[qkv_spec, qkv_spec, qkv_spec,
                      w_spec, w_spec, w_spec,
                      b_spec, b_spec, b_spec],
            out_specs=[head_out_spec, head_out_spec, head_out_spec],
        ),
        compiler_params=pltpu.CompilerParams(
            dimension_semantics=("parallel",)),
    )(q, k, v, wq_b, wk_b, wv_b, bq, bk, bv)

    # ---- Kernel 2: attention + output projection (grid over batch, heads) ---
    hd_spec = pl.BlockSpec((1, 1, S, depth), lambda b, h: (b, h, 0, 0))
    mask_spec = pl.BlockSpec((1, 1, Mq, S), lambda b, h: (b, 0, 0, 0))
    wo_spec = pl.BlockSpec((1, depth, D), lambda b, h: (h, 0, 0))
    bo_spec = pl.BlockSpec((1, D), lambda b, h: (0, 0))

    out, attn = pl.pallas_call(
        _attn_kernel,
        out_shape=(
            jax.ShapeDtypeStruct((B, S, D), jnp.float32),
            jax.ShapeDtypeStruct((B, num_heads, S, S), jnp.float32),
        ),
        grid_spec=pltpu.PrefetchScalarGridSpec(
            num_scalar_prefetch=0,
            grid=(B, num_heads),
            in_specs=[hd_spec, hd_spec, hd_spec, mask_spec, wo_spec, bo_spec],
            out_specs=[
                pl.BlockSpec((1, S, D), lambda b, h: (b, 0, 0)),        # accumulator
                pl.BlockSpec((1, 1, S, S), lambda b, h: (b, h, 0, 0)),  # per-head attn
            ],
        ),
        compiler_params=pltpu.CompilerParams(
            dimension_semantics=("parallel", "arbitrary")),
    )(qh, kh, vh, mask, wo_h, bo)
    return out, attn


def _reference(q, k, v, mask, params, num_heads):
    """Pure-JAX f32 reference mirroring the PyTorch forward."""
    B, S, D = q.shape
    depth = D // num_heads
    wq, bq, wk, bk, wv, bv, wo, bo = params

    def split(x):  # (B,S,D) -> (B,H,S,depth)
        return x.reshape(B, S, num_heads, depth).transpose(0, 2, 1, 3)

    Q = split(q @ wq + bq)
    K = split(k @ wk + bk)
    V = split(v @ wv + bv)
    logits = jnp.einsum("bhqd,bhkd->bhqk", Q, K) / math.sqrt(depth)
    logits = logits + mask * (-1e9)
    w = jax.nn.softmax(logits, axis=-1)
    out = jnp.einsum("bhqk,bhkd->bhqd", w, V)
    out = out.transpose(0, 2, 1, 3).reshape(B, S, D)
    return out @ wo + bo, w


if __name__ == "__main__":
    B, S, D, H = 2, 8, 32, 4

    key = jax.random.PRNGKey(0)
    keys = jax.random.split(key, 12)

    # Deterministic parameter init (Linear weights as (in, out)).
    init = lambda kk, shape: (jax.random.normal(kk, shape, jnp.float32)
                              / math.sqrt(D))
    wq, wk, wv, wo = (init(keys[i], (D, D)) for i in range(4))
    bq, bk, bv, bo = (0.01 * jax.random.normal(keys[4 + i], (1, D), jnp.float32)
                      for i in range(4))
    params = (wq, bq, wk, bk, wv, bv, wo, bo)

    q = jax.random.normal(keys[8], (B, S, D), jnp.float32)
    k = jax.random.normal(keys[9], (B, S, D), jnp.float32)
    v = jax.random.normal(keys[10], (B, S, D), jnp.float32)
    # Compact key-padding mask (1.0 = masked out); kernel broadcasts over
    # heads / query positions — no pre-broadcast (B,1,S,S) mask DMA'd.
    mask = (jax.random.uniform(keys[11], (B, 1, 1, S)) < 0.25).astype(jnp.float32)

    out, attn = multi_head_attention(q, k, v, mask, params, num_heads=H)
    jax.block_until_ready((out, attn))

    ref_out, ref_attn = _reference(q, k, v, mask, params, H)
    # bf16 MXU inputs + approx reciprocal => loosen tolerances vs f32 reference.
    attn_err = np.max(np.abs(np.asarray(attn) - np.asarray(ref_attn)))
    out_err = np.max(np.abs(np.asarray(out) - np.asarray(ref_out)))
    assert np.allclose(np.asarray(attn), np.asarray(ref_attn),
                       atol=2e-2, rtol=2e-2), attn_err
    assert np.allclose(np.asarray(out), np.asarray(ref_out),
                       atol=5e-2, rtol=5e-2), out_err

    print("KERNEL_OK")
</pallas_src>

<mosaic_0001>
module attributes {stable_mosaic.version = 11 : i64} {
  func.func @_qkv_proj_kernel(%arg0: i32, %arg1: memref<1x8x32xf32, #tpu.memory_space<vmem>>, %arg2: memref<1x8x32xf32, #tpu.memory_space<vmem>>, %arg3: memref<1x8x32xf32, #tpu.memory_space<vmem>>, %arg4: memref<32x32xbf16, #tpu.memory_space<vmem>>, %arg5: memref<32x32xbf16, #tpu.memory_space<vmem>>, %arg6: memref<32x32xbf16, #tpu.memory_space<vmem>>, %arg7: memref<1x32xf32, #tpu.memory_space<vmem>>, %arg8: memref<1x32xf32, #tpu.memory_space<vmem>>, %arg9: memref<1x32xf32, #tpu.memory_space<vmem>>, %arg10: memref<1x4x8x8xbf16, #tpu.memory_space<vmem>>, %arg11: memref<1x4x8x8xbf16, #tpu.memory_space<vmem>>, %arg12: memref<1x4x8x8xbf16, #tpu.memory_space<vmem>>) attributes {dimension_semantics = [#tpu.dimension_semantics<parallel>], iteration_bounds = array<i64: 2>, scalar_prefetch = 0 : i64, scratch_operands = 0 : i64, tpu.core_type = #tpu.core_type<tc>, window_params = [{transform_indices = @transform_0, window_bounds = array<i64: 1, 8, 32>}, {transform_indices = @transform_1, window_bounds = array<i64: 1, 8, 32>}, {transform_indices = @transform_2, window_bounds = array<i64: 1, 8, 32>}, {pipeline_mode = #tpu.pipeline_mode<synchronous>, transform_indices = @transform_3, window_bounds = array<i64: 32, 32>}, {pipeline_mode = #tpu.pipeline_mode<synchronous>, transform_indices = @transform_4, window_bounds = array<i64: 32, 32>}, {pipeline_mode = #tpu.pipeline_mode<synchronous>, transform_indices = @transform_5, window_bounds = array<i64: 32, 32>}, {pipeline_mode = #tpu.pipeline_mode<synchronous>, transform_indices = @transform_6, window_bounds = array<i64: 1, 32>}, {pipeline_mode = #tpu.pipeline_mode<synchronous>, transform_indices = @transform_7, window_bounds = array<i64: 1, 32>}, {pipeline_mode = #tpu.pipeline_mode<synchronous>, transform_indices = @transform_8, window_bounds = array<i64: 1, 32>}, {transform_indices = @transform_9, window_bounds = array<i64: 1, 4, 8, 8>}, {transform_indices = @transform_10, window_bounds = array<i64: 1, 4, 8, 8>}, {transform_indices = @transform_11, window_bounds = array<i64: 1, 4, 8, 8>}]} {
    %c0 = arith.constant 0 : index
    %c0_0 = arith.constant 0 : index
    %c0_1 = arith.constant 0 : index
    %0 = vector.load %arg1[%c0, %c0_0, %c0_1] : memref<1x8x32xf32, #tpu.memory_space<vmem>>, vector<1x8x32xf32>
    %1 = vector.shape_cast %0 : vector<1x8x32xf32> to vector<8x32xf32>
    %2 = arith.truncf %1 : vector<8x32xf32> to vector<8x32xbf16>
    %c0_2 = arith.constant 0 : index
    %c0_3 = arith.constant 0 : index
    %3 = vector.load %arg4[%c0_2, %c0_3] : memref<32x32xbf16, #tpu.memory_space<vmem>>, vector<32x32xbf16>
    %cst = arith.constant dense<0.000000e+00> : vector<8x32xf32>
    %4 = tpu.matmul %2, %3, %cst {dimension_numbers = #tpu.dot_dimension_numbers<[1], [0], [0], [1], [0, 0, 1, 1], [], []>} : vector<8x32xbf16>, vector<32x32xbf16>, vector<8x32xf32> -> vector<8x32xf32>
    %c0_4 = arith.constant 0 : index
    %c0_5 = arith.constant 0 : index
    %5 = vector.load %arg7[%c0_4, %c0_5] : memref<1x32xf32, #tpu.memory_space<vmem>>, vector<1x32xf32>
    %6 = vector.broadcast %5 : vector<1x32xf32> to vector<8x32xf32>
    %7 = arith.addf %4, %6 : vector<8x32xf32>
    %cst_6 = arith.constant 0.353553385 : f32
    %8 = vector.broadcast %cst_6 : f32 to vector<8x32xf32>
    %9 = arith.mulf %7, %8 : vector<8x32xf32>
    %c0_7 = arith.constant 0 : index
    %c0_8 = arith.constant 0 : index
    %c0_9 = arith.constant 0 : index
    %10 = vector.load %arg2[%c0_7, %c0_8, %c0_9] : memref<1x8x32xf32, #tpu.memory_space<vmem>>, vector<1x8x32xf32>
    %11 = vector.shape_cast %10 : vector<1x8x32xf32> to vector<8x32xf32>
    %12 = arith.truncf %11 : vector<8x32xf32> to vector<8x32xbf16>
    %c0_10 = arith.constant 0 : index
    %c0_11 = arith.constant 0 : index
    %13 = vector.load %arg5[%c0_10, %c0_11] : memref<32x32xbf16, #tpu.memory_space<vmem>>, vector<32x32xbf16>
    %cst_12 = arith.constant dense<0.000000e+00> : vector<8x32xf32>
    %14 = tpu.matmul %12, %13, %cst_12 {dimension_numbers = #tpu.dot_dimension_numbers<[1], [0], [0], [1], [0, 0, 1, 1], [], []>} : vector<8x32xbf16>, vector<32x32xbf16>, vector<8x32xf32> -> vector<8x32xf32>
    %c0_13 = arith.constant 0 : index
    %c0_14 = arith.constant 0 : index
    %15 = vector.load %arg8[%c0_13, %c0_14] : memref<1x32xf32, #tpu.memory_space<vmem>>, vector<1x32xf32>
    %16 = vector.broadcast %15 : vector<1x32xf32> to vector<8x32xf32>
    %17 = arith.addf %14, %16 : vector<8x32xf32>
    %c0_15 = arith.constant 0 : index
    %c0_16 = arith.constant 0 : index
    %c0_17 = arith.constant 0 : index
    %18 = vector.load %arg3[%c0_15, %c0_16, %c0_17] : memref<1x8x32xf32, #tpu.memory_space<vmem>>, vector<1x8x32xf32>
    %19 = vector.shape_cast %18 : vector<1x8x32xf32> to vector<8x32xf32>
    %20 = arith.truncf %19 : vector<8x32xf32> to vector<8x32xbf16>
    %c0_18 = arith.constant 0 : index
    %c0_19 = arith.constant 0 : index
    %21 = vector.load %arg6[%c0_18, %c0_19] : memref<32x32xbf16, #tpu.memory_space<vmem>>, vector<32x32xbf16>
    %cst_20 = arith.constant dense<0.000000e+00> : vector<8x32xf32>
    %22 = tpu.matmul %20, %21, %cst_20 {dimension_numbers = #tpu.dot_dimension_numbers<[1], [0], [0], [1], [0, 0, 1, 1], [], []>} : vector<8x32xbf16>, vector<32x32xbf16>, vector<8x32xf32> -> vector<8x32xf32>
    %c0_21 = arith.constant 0 : index
    %c0_22 = arith.constant 0 : index
    %23 = vector.load %arg9[%c0_21, %c0_22] : memref<1x32xf32, #tpu.memory_space<vmem>>, vector<1x32xf32>
    %24 = vector.broadcast %23 : vector<1x32xf32> to vector<8x32xf32>
    %25 = arith.addf %22, %24 : vector<8x32xf32>
    %26 = vector.extract_strided_slice %9 {offsets = [0, 0], sizes = [8, 8], strides = [1, 1]} : vector<8x32xf32> to vector<8x8xf32>
    %27 = arith.truncf %26 : vector<8x8xf32> to vector<8x8xbf16>
    %c0_23 = arith.constant 0 : index
    %c0_24 = arith.constant 0 : index
    %c0_25 = arith.constant 0 : index
    %c0_26 = arith.constant 0 : index
    %28 = vector.load %arg10[%c0_23, %c0_24, %c0_25, %c0_26] : memref<1x4x8x8xbf16, #tpu.memory_space<vmem>>, vector<1x1x8x8xbf16>
    %29 = vector.shape_cast %28 : vector<1x1x8x8xbf16> to vector<8x8xbf16>
    %30 = vector.shape_cast %27 : vector<8x8xbf16> to vector<1x1x8x8xbf16>
    tpu.vector_store %arg10[%c0_23, %c0_24, %c0_25, %c0_26], %30 {strides = array<i32>} : memref<1x4x8x8xbf16, #tpu.memory_space<vmem>>, vector<1x1x8x8xbf16>,
    %31 = vector.extract_strided_slice %17 {offsets = [0, 0], sizes = [8, 8], strides = [1, 1]} : vector<8x32xf32> to vector<8x8xf32>
    %32 = arith.truncf %31 : vector<8x8xf32> to vector<8x8xbf16>
    %c0_27 = arith.constant 0 : index
    %c0_28 = arith.constant 0 : index
    %c0_29 = arith.constant 0 : index
    %c0_30 = arith.constant 0 : index
    %33 = vector.load %arg11[%c0_27, %c0_28, %c0_29, %c0_30] : memref<1x4x8x8xbf16, #tpu.memory_space<vmem>>, vector<1x1x8x8xbf16>
    %34 = vector.shape_cast %33 : vector<1x1x8x8xbf16> to vector<8x8xbf16>
    %35 = vector.shape_cast %32 : vector<8x8xbf16> to vector<1x1x8x8xbf16>
    tpu.vector_store %arg11[%c0_27, %c0_28, %c0_29, %c0_30], %35 {strides = array<i32>} : memref<1x4x8x8xbf16, #tpu.memory_space<vmem>>, vector<1x1x8x8xbf16>,
    %36 = vector.extract_strided_slice %25 {offsets = [0, 0], sizes = [8, 8], strides = [1, 1]} : vector<8x32xf32> to vector<8x8xf32>
    %37 = arith.truncf %36 : vector<8x8xf32> to vector<8x8xbf16>
    %c0_31 = arith.constant 0 : index
    %c0_32 = arith.constant 0 : index
    %c0_33 = arith.constant 0 : index
    %c0_34 = arith.constant 0 : index
    %38 = vector.load %arg12[%c0_31, %c0_32, %c0_33, %c0_34] : memref<1x4x8x8xbf16, #tpu.memory_space<vmem>>, vector<1x1x8x8xbf16>
    %39 = vector.shape_cast %38 : vector<1x1x8x8xbf16> to vector<8x8xbf16>
    %40 = vector.shape_cast %37 : vector<8x8xbf16> to vector<1x1x8x8xbf16>
    tpu.vector_store %arg12[%c0_31, %c0_32, %c0_33, %c0_34], %40 {strides = array<i32>} : memref<1x4x8x8xbf16, #tpu.memory_space<vmem>>, vector<1x1x8x8xbf16>,
    %41 = vector.extract_strided_slice %9 {offsets = [0, 8], sizes = [8, 8], strides = [1, 1]} : vector<8x32xf32> to vector<8x8xf32>
    %42 = arith.truncf %41 : vector<8x8xf32> to vector<8x8xbf16>
    %c0_35 = arith.constant 0 : index
    %c1 = arith.constant 1 : index
    %c0_36 = arith.constant 0 : index
    %c0_37 = arith.constant 0 : index
    %43 = vector.load %arg10[%c0_35, %c1, %c0_36, %c0_37] : memref<1x4x8x8xbf16, #tpu.memory_space<vmem>>, vector<1x1x8x8xbf16>
    %44 = vector.shape_cast %43 : vector<1x1x8x8xbf16> to vector<8x8xbf16>
    %45 = vector.shape_cast %42 : vector<8x8xbf16> to vector<1x1x8x8xbf16>
    tpu.vector_store %arg10[%c0_35, %c1, %c0_36, %c0_37], %45 {strides = array<i32>} : memref<1x4x8x8xbf16, #tpu.memory_space<vmem>>, vector<1x1x8x8xbf16>,
    %46 = vector.extract_strided_slice %17 {offsets = [0, 8], sizes = [8, 8], strides = [1, 1]} : vector<8x32xf32> to vector<8x8xf32>
    %47 = arith.truncf %46 : vector<8x8xf32> to vector<8x8xbf16>
    %c0_38 = arith.constant 0 : index
    %c1_39 = arith.constant 1 : index
    %c0_40 = arith.constant 0 : index
    %c0_41 = arith.constant 0 : index
    %48 = vector.load %arg11[%c0_38, %c1_39, %c0_40, %c0_41] : memref<1x4x8x8xbf16, #tpu.memory_space<vmem>>, vector<1x1x8x8xbf16>
    %49 = vector.shape_cast %48 : vector<1x1x8x8xbf16> to vector<8x8xbf16>
    %50 = vector.shape_cast %47 : vector<8x8xbf16> to vector<1x1x8x8xbf16>
    tpu.vector_store %arg11[%c0_38, %c1_39, %c0_40, %c0_41], %50 {strides = array<i32>} : memref<1x4x8x8xbf16, #tpu.memory_space<vmem>>, vector<1x1x8x8xbf16>,
    %51 = vector.extract_strided_slice %25 {offsets = [0, 8], sizes = [8, 8], strides = [1, 1]} : vector<8x32xf32> to vector<8x8xf32>
    %52 = arith.truncf %51 : vector<8x8xf32> to vector<8x8xbf16>
    %c0_42 = arith.constant 0 : index
    %c1_43 = arith.constant 1 : index
    %c0_44 = arith.constant 0 : index
    %c0_45 = arith.constant 0 : index
    %53 = vector.load %arg12[%c0_42, %c1_43, %c0_44, %c0_45] : memref<1x4x8x8xbf16, #tpu.memory_space<vmem>>, vector<1x1x8x8xbf16>
    %54 = vector.shape_cast %53 : vector<1x1x8x8xbf16> to vector<8x8xbf16>
    %55 = vector.shape_cast %52 : vector<8x8xbf16> to vector<1x1x8x8xbf16>
    tpu.vector_store %arg12[%c0_42, %c1_43, %c0_44, %c0_45], %55 {strides = array<i32>} : memref<1x4x8x8xbf16, #tpu.memory_space<vmem>>, vector<1x1x8x8xbf16>,
    %56 = vector.extract_strided_slice %9 {offsets = [0, 16], sizes = [8, 8], strides = [1, 1]} : vector<8x32xf32> to vector<8x8xf32>
    %57 = arith.truncf %56 : vector<8x8xf32> to vector<8x8xbf16>
    %c0_46 = arith.constant 0 : index
    %c2 = arith.constant 2 : index
    %c0_47 = arith.constant 0 : index
    %c0_48 = arith.constant 0 : index
    %58 = vector.load %arg10[%c0_46, %c2, %c0_47, %c0_48] : memref<1x4x8x8xbf16, #tpu.memory_space<vmem>>, vector<1x1x8x8xbf16>
    %59 = vector.shape_cast %58 : vector<1x1x8x8xbf16> to vector<8x8xbf16>
    %60 = vector.shape_cast %57 : vector<8x8xbf16> to vector<1x1x8x8xbf16>
    tpu.vector_store %arg10[%c0_46, %c2, %c0_47, %c0_48], %60 {strides = array<i32>} : memref<1x4x8x8xbf16, #tpu.memory_space<vmem>>, vector<1x1x8x8xbf16>,
    %61 = vector.extract_strided_slice %17 {offsets = [0, 16], sizes = [8, 8], strides = [1, 1]} : vector<8x32xf32> to vector<8x8xf32>
    %62 = arith.truncf %61 : vector<8x8xf32> to vector<8x8xbf16>
    %c0_49 = arith.constant 0 : index
    %c2_50 = arith.constant 2 : index
    %c0_51 = arith.constant 0 : index
    %c0_52 = arith.constant 0 : index
    %63 = vector.load %arg11[%c0_49, %c2_50, %c0_51, %c0_52] : memref<1x4x8x8xbf16, #tpu.memory_space<vmem>>, vector<1x1x8x8xbf16>
    %64 = vector.shape_cast %63 : vector<1x1x8x8xbf16> to vector<8x8xbf16>
    %65 = vector.shape_cast %62 : vector<8x8xbf16> to vector<1x1x8x8xbf16>
    tpu.vector_store %arg11[%c0_49, %c2_50, %c0_51, %c0_52], %65 {strides = array<i32>} : memref<1x4x8x8xbf16, #tpu.memory_space<vmem>>, vector<1x1x8x8xbf16>,
    %66 = vector.extract_strided_slice %25 {offsets = [0, 16], sizes = [8, 8], strides = [1, 1]} : vector<8x32xf32> to vector<8x8xf32>
    %67 = arith.truncf %66 : vector<8x8xf32> to vector<8x8xbf16>
    %c0_53 = arith.constant 0 : index
    %c2_54 = arith.constant 2 : index
    %c0_55 = arith.constant 0 : index
    %c0_56 = arith.constant 0 : index
    %68 = vector.load %arg12[%c0_53, %c2_54, %c0_55, %c0_56] : memref<1x4x8x8xbf16, #tpu.memory_space<vmem>>, vector<1x1x8x8xbf16>
    %69 = vector.shape_cast %68 : vector<1x1x8x8xbf16> to vector<8x8xbf16>
    %70 = vector.shape_cast %67 : vector<8x8xbf16> to vector<1x1x8x8xbf16>
    tpu.vector_store %arg12[%c0_53, %c2_54, %c0_55, %c0_56], %70 {strides = array<i32>} : memref<1x4x8x8xbf16, #tpu.memory_space<vmem>>, vector<1x1x8x8xbf16>,
    %71 = vector.extract_strided_slice %9 {offsets = [0, 24], sizes = [8, 8], strides = [1, 1]} : vector<8x32xf32> to vector<8x8xf32>
    %72 = arith.truncf %71 : vector<8x8xf32> to vector<8x8xbf16>
    %c0_57 = arith.constant 0 : index
    %c3 = arith.constant 3 : index
    %c0_58 = arith.constant 0 : index
    %c0_59 = arith.constant 0 : index
    %73 = vector.load %arg10[%c0_57, %c3, %c0_58, %c0_59] : memref<1x4x8x8xbf16, #tpu.memory_space<vmem>>, vector<1x1x8x8xbf16>
    %74 = vector.shape_cast %73 : vector<1x1x8x8xbf16> to vector<8x8xbf16>
    %75 = vector.shape_cast %72 : vector<8x8xbf16> to vector<1x1x8x8xbf16>
    tpu.vector_store %arg10[%c0_57, %c3, %c0_58, %c0_59], %75 {strides = array<i32>} : memref<1x4x8x8xbf16, #tpu.memory_space<vmem>>, vector<1x1x8x8xbf16>,
    %76 = vector.extract_strided_slice %17 {offsets = [0, 24], sizes = [8, 8], strides = [1, 1]} : vector<8x32xf32> to vector<8x8xf32>
    %77 = arith.truncf %76 : vector<8x8xf32> to vector<8x8xbf16>
    %c0_60 = arith.constant 0 : index
    %c3_61 = arith.constant 3 : index
    %c0_62 = arith.constant 0 : index
    %c0_63 = arith.constant 0 : index
    %78 = vector.load %arg11[%c0_60, %c3_61, %c0_62, %c0_63] : memref<1x4x8x8xbf16, #tpu.memory_space<vmem>>, vector<1x1x8x8xbf16>
    %79 = vector.shape_cast %78 : vector<1x1x8x8xbf16> to vector<8x8xbf16>
    %80 = vector.shape_cast %77 : vector<8x8xbf16> to vector<1x1x8x8xbf16>
    tpu.vector_store %arg11[%c0_60, %c3_61, %c0_62, %c0_63], %80 {strides = array<i32>} : memref<1x4x8x8xbf16, #tpu.memory_space<vmem>>, vector<1x1x8x8xbf16>,
    %81 = vector.extract_strided_slice %25 {offsets = [0, 24], sizes = [8, 8], strides = [1, 1]} : vector<8x32xf32> to vector<8x8xf32>
    %82 = arith.truncf %81 : vector<8x8xf32> to vector<8x8xbf16>
    %c0_64 = arith.constant 0 : index
    %c3_65 = arith.constant 3 : index
    %c0_66 = arith.constant 0 : index
    %c0_67 = arith.constant 0 : index
    %83 = vector.load %arg12[%c0_64, %c3_65, %c0_66, %c0_67] : memref<1x4x8x8xbf16, #tpu.memory_space<vmem>>, vector<1x1x8x8xbf16>
    %84 = vector.shape_cast %83 : vector<1x1x8x8xbf16> to vector<8x8xbf16>
    %85 = vector.shape_cast %82 : vector<8x8xbf16> to vector<1x1x8x8xbf16>
    tpu.vector_store %arg12[%c0_64, %c3_65, %c0_66, %c0_67], %85 {strides = array<i32>} : memref<1x4x8x8xbf16, #tpu.memory_space<vmem>>, vector<1x1x8x8xbf16>,
    return
  }
  func.func @transform_0(%arg0: i32) -> (i32, i32, i32) {
    %c0_i32 = arith.constant 0 : i32
    %c0_i32_0 = arith.constant 0 : i32
    %c0_i32_1 = arith.constant 0 : i32
    return %arg0, %c0_i32, %c0_i32_0 : i32, i32, i32
  }
  func.func @transform_1(%arg0: i32) -> (i32, i32, i32) {
    %c0_i32 = arith.constant 0 : i32
    %c0_i32_0 = arith.constant 0 : i32
    %c0_i32_1 = arith.constant 0 : i32
    return %arg0, %c0_i32, %c0_i32_0 : i32, i32, i32
  }
  func.func @transform_2(%arg0: i32) -> (i32, i32, i32) {
    %c0_i32 = arith.constant 0 : i32
    %c0_i32_0 = arith.constant 0 : i32
    %c0_i32_1 = arith.constant 0 : i32
    return %arg0, %c0_i32, %c0_i32_0 : i32, i32, i32
  }
  func.func @transform_3(%arg0: i32) -> (i32, i32) {
    %c0_i32 = arith.constant 0 : i32
    %c0_i32_0 = arith.constant 0 : i32
    %c0_i32_1 = arith.constant 0 : i32
    return %c0_i32, %c0_i32_0 : i32, i32
  }
  func.func @transform_4(%arg0: i32) -> (i32, i32) {
    %c0_i32 = arith.constant 0 : i32
    %c0_i32_0 = arith.constant 0 : i32
    %c0_i32_1 = arith.constant 0 : i32
    return %c0_i32, %c0_i32_0 : i32, i32
  }
  func.func @transform_5(%arg0: i32) -> (i32, i32) {
    %c0_i32 = arith.constant 0 : i32
    %c0_i32_0 = arith.constant 0 : i32
    %c0_i32_1 = arith.constant 0 : i32
    return %c0_i32, %c0_i32_0 : i32, i32
  }
  func.func @transform_6(%arg0: i32) -> (i32, i32) {
    %c0_i32 = arith.constant 0 : i32
    %c0_i32_0 = arith.constant 0 : i32
    %c0_i32_1 = arith.constant 0 : i32
    return %c0_i32, %c0_i32_0 : i32, i32
  }
  func.func @transform_7(%arg0: i32) -> (i32, i32) {
    %c0_i32 = arith.constant 0 : i32
    %c0_i32_0 = arith.constant 0 : i32
    %c0_i32_1 = arith.constant 0 : i32
    return %c0_i32, %c0_i32_0 : i32, i32
  }
  func.func @transform_8(%arg0: i32) -> (i32, i32) {
    %c0_i32 = arith.constant 0 : i32
    %c0_i32_0 = arith.constant 0 : i32
    %c0_i32_1 = arith.constant 0 : i32
    return %c0_i32, %c0_i32_0 : i32, i32
  }
  func.func @transform_9(%arg0: i32) -> (i32, i32, i32, i32) {
    %c0_i32 = arith.constant 0 : i32
    %c0_i32_0 = arith.constant 0 : i32
    %c0_i32_1 = arith.constant 0 : i32
    %c0_i32_2 = arith.constant 0 : i32
    return %arg0, %c0_i32, %c0_i32_0, %c0_i32_1 : i32, i32, i32, i32
  }
  func.func @transform_10(%arg0: i32) -> (i32, i32, i32, i32) {
    %c0_i32 = arith.constant 0 : i32
    %c0_i32_0 = arith.constant 0 : i32
    %c0_i32_1 = arith.constant 0 : i32
    %c0_i32_2 = arith.constant 0 : i32
    return %arg0, %c0_i32, %c0_i32_0, %c0_i32_1 : i32, i32, i32, i32
  }
  func.func @transform_11(%arg0: i32) -> (i32, i32, i32, i32) {
    %c0_i32 = arith.constant 0 : i32
    %c0_i32_0 = arith.constant 0 : i32
    %c0_i32_1 = arith.constant 0 : i32
    %c0_i32_2 = arith.constant 0 : i32
    return %arg0, %c0_i32, %c0_i32_0, %c0_i32_1 : i32, i32, i32, i32
  }
}

</mosaic_0001>

<bundles_post_ra>
// kernel: tpu_custom_call.1
= control target key start
LH: loop header
LB: loop body
LE: loop exit
PB: predicated region body
PF: predicated region fallthrough
CT: control target
= control target key end

     0   :  { %s2043_s0 = inlined_call_operand.hbm [shape: f32[2,8,32], index: 0, kind: input, shape index: {}]   ;;  %s2044_s1 = inlined_call_operand.hbm [shape: f32[2,8,32], index: 1, kind: input, shape index: {}]   ;;  %s2045_s2 = inlined_call_operand.hbm [shape: f32[2,8,32], index: 2, kind: input, shape index: {}]   ;;  %s2046_s3 = inlined_call_operand.hbm [shape: bf16[32,32], index: 3, kind: input, shape index: {}]   ;;  %s2047_s4 = inlined_call_operand.hbm [shape: bf16[32,32], index: 4, kind: input, shape index: {}]   ;;  %s2048_s5 = inlined_call_operand.vmem [shape: bf16[32,32], index: 5, kind: input, shape index: {}]   ;;  %s2049_s6 = inlined_call_operand.vmem [shape: f32[1,32], index: 6, kind: input, shape index: {}]   ;;  %s2050_s7 = inlined_call_operand.vmem [shape: f32[1,32], index: 7, kind: input, shape index: {}]   ;;  %s2051_s8 = inlined_call_operand.vmem [shape: f32[1,32], index: 8, kind: input, shape index: {}]   ;;  %s2052_s9 = inlined_call_operand.hbm [shape: bf16[2,4,8,8], index: 9, kind: output, shape index: {0}]   ;;  %s2053_s10 = inlined_call_operand.hbm [shape: bf16[2,4,8,8], index: 10, kind: output, shape index: {1}]   ;;  %s2054_s11 = inlined_call_operand.hbm [shape: bf16[2,4,8,8], index: 11, kind: output, shape index: {2}]  }
   0x1   :  { %2078 = sst [smem:[#allocation25_spill]] %s2044_s1 }
   0x2   :  { %2079 = sst [smem:[#allocation26_spill]] %s2046_s3 }
   0x3   :  { %2080 = sst [smem:[#allocation27_spill]] %s2052_s9 }
   0x4   :  { %2081 = sst [smem:[#allocation28_spill]] %s2054_s11 }
   0x5   :  { %17 = vsyncpa [#allocation3], 0 }
   0x6   :  { %19 = vsyncpa [#allocation3 + $0x1], 0 }
   0x7   :  { %20 = vsyncpa [#allocation6], 0 }
   0x8   :  { %22 = vsyncpa [#allocation6 + $0x1], 0 }
   0x9   :  { %23 = vsyncpa [#allocation9], 0 }
   0xa   :  { %24 = vsyncpa [#allocation4], 0 }
   0xb   :  { %26 = vsyncpa [#allocation4 + $0x1], 0 }
   0xc   :  { %27 = vsyncpa [#allocation13], 0 }
   0xd   :  { %29 = vsyncpa [#allocation13 + $0x1], 0  ;;  %s1595_s17 = smov 0   ;;  %s1597_s18 = smov 0  }
   0xe   :  { %s1599_s19 = smov 0   ;;  %s1601_s20 = smov 0  }
   0xf LB: > { %2082 = sst [smem:[#allocation20_spill]] %s1504_s17  ;;  %s1616_s21 = sadd.s32 4294967295, %s1516_s20   ;;  %s1516_s20 = sphi %s1601_s20, %s2119_s20   ;;  %s1512_s19 = sphi %s1599_s19, %s2123_s19   ;;  %s1508_s18 = sphi %s1597_s18, %s2122_s18   ;;  %s1504_s17 = sphi %s1595_s17, %s2121_s17  }
  0x10   : > { %2083 = sst [smem:[#allocation21_spill]] %s1516_s20  ;;  %s2055_s22 = sadd.s32 4294967294, %s1516_s20  }
  0x11   : > { %p55_p0 = scmp.ne.s32.totalorder %s1508_s18, %s1504_s17  ;;  %p2057_p1 = scmp.eq.s32.totalorder %s1616_s21, 0 }
  0x12   : > { %p263_p3 = scmp.eq.s32.totalorder %s2055_s22, 1  ;;  %p1041_p5 = scmp.ge.s32.totalorder %s1516_s20, 1 }
  0x13   : > { %p1627_p4 = por %p2057_p1, %p55_p0  ;;  %p322_p7 = scmp.lt.s32.totalorder %s1516_s20, 3 }
  0x14   : > { %p1632_p6 = por %p263_p3, %p55_p0  ;;  %s1518_s26 = smov [#allocation8]  }
  0x15   : > { %s2084_s23 = scalar_select %p1627_p4, 1, 0 }
  0x16   : > { %s2085_s24 = scalar_select %p1632_p6, 1, 0 }
  0x17   : > { %p1637_p8 = pnand %p1041_p5, %p322_p7  ;;  %s334_s27 = sshll.u32 %s1518_s26, 4  ;;  %s1641_s27 = int_to_ptr.vmem [resolvable:$true] %s334_s27 }
  0x18   : > { %2086 = sst [smem:[#allocation22_spill]] %s2085_s24  ;;  %s1653_s29 = sadd.s32 1, %s1516_s20  }
  0x19   : > { %s2087_s25 = scalar_select %p1637_p8, 1, 0 }
  0x1a   : > { %p1154_p9 = pneg %p1637_p8  ;;  %2089 = sst [smem:[#allocation23_spill]] %s1653_s29 }
  0x1b   : > { %s42_s30 = sadd.s32 1, %s1512_s19  ;;  %s39_s12 = ssub.s32 %s1516_s20, %s1653_s29 }
  0x1c   : > { %p1648_p11 = pnand %p1154_p9, %p2057_p1  ;;  %s2090_s3 = sld [smem:[#allocation26_spill]] }
  0x1e   : > { %s2088_s28 = scalar_select %p1648_p11, 1, 0 }
  0x1f   : > { %p2067_p13 = pneg %p1648_p11 }
  0x22   : > { %s1236_s15 = scalar_lea.hbm %s2090_s3, 256 }
  0x23   : > { %p1237_p12 = scmp.ne.s32.totalorder %s2090_s3, %s1236_s15  ;;  %p1243_p5 = scmp.lt.u32.totalorder %s1236_s15, %s2090_s3 }
  0x25   : > { %p1239_p0 = pnand %p2067_p13, %p1237_p12 }
  0x27   : > { %p1240_p3 = pneg %p1239_p0 }
  0x29   : > { %p1245_p7 = pnand %p1243_p5, %p1240_p3 }
  0x2b   : > { %1248 = shalt.err (!%p1245_p7)
}
  0x2c   : > { %s1249_s13 = scalar_lea.vmem %s1641_s27, 256  ;;  %p1257_p2 = scmp.lt.s32.totalorder %s1641_s27, %s1641_s27 }
  0x2d   : > { %p1250_p9 = scmp.ne.s32.totalorder %s1641_s27, %s1249_s13  ;;  %p1258_p12 = scmp.lt.s32.totalorder %s1249_s13, %s1249_s13 }
  0x2f   : > { %p1252_p10 = pnand %p1250_p9, %p2067_p13  ;;  %p1259_p0 = por %p1258_p12, %p1257_p2 }
  0x31   : > { %p1253_p1 = pneg %p1252_p10 }
  0x33   : > { %p1260_p6 = pnand %p1259_p0, %p1253_p1 }
  0x35   : > { %1263 = shalt.err (!%p1260_p6)
}
  0x36   : > { %s2061_s22 = smov 64   ;;  %s2062_s24 = smov 4  }
  0x37   : > { %1157 = dma.hbm_to_vmem [thread:$0]  (!%p1648_p11), %s2090_s3, 256, %s1641_s27, [#allocation9], %s2061_s22, %s2061_s22, %s2062_s24  }
  0x38   : > { %p40_p1 = scmp.eq.s32.totalorder %s39_s12, 0  ;;  %p49_p2 = scmp.ne.s32.totalorder %s1512_s19, %s1508_s18 }
  0x39   : > { %p50_p6 = scmp.eq.s32.totalorder %s1516_s20, 0  ;;  %p1183_p10 = scmp.lt.s32.totalorder %s1516_s20, 2 }
  0x3a   : > { %s1693_s16 = scalar_select %p40_p1, %s1512_s19, %s42_s30  }
  0x3b   : > { %p51_p3 = por %p50_p6, %p49_p2  ;;  %p2092_p5 = scmp.eq.s32.totalorder %s1616_s21, 1 }
  0x3c   : > { %2091 = sst [smem:[#allocation24_spill]] %s1693_s16  ;;  %s2063_s13 = sand.u32 1, %s1512_s19  }
  0x3d   : > { %p1697_p7 = por %p2092_p5, %p49_p2  ;;  %s1703_s29 = sshll.u32 %s1516_s20, 7 }
  0x3e   : > { %s1707_s17 = sshll.u32 %s2063_s13, 3  ;;  %p1709_p9 = pnand %p1183_p10, %p51_p3 }
  0x3f   : > { %s2093_s26 = scalar_select %p1697_p7, 1, 0 }
  0x40   : > { %s2094_s27 = scalar_select %p1709_p9, 1, 0 }
  0x41   : > { %s391_s30 = sand.u32 1, %s1516_s20   ;;  %s2095_s1 = sld [smem:[#allocation25_spill]] }
  0x42   : > { %s395_s22 = scalar_lea.vmem [#allocation5], %s1707_s17  ;;  %s1723_s13 = scalar_lea.sflag [#allocation6], %s391_s30 }
  0x43   : > { %s402_s24 = sshll.u32 %s395_s22, 4  ;;  %p1729_p0 = pneg %p1709_p9  ;;  %s1721_s24 = int_to_ptr.vmem [resolvable:$true] %s402_s24 }
  0x45   : > { %s2096_s16 = scalar_select %p1729_p0, 1, 0 }
  0x47   : > { %s1718_s15 = scalar_lea.hbm %s2095_s1, %s1703_s29  ;;  %s1269_s20 = scalar_lea.hbm %s2095_s1, 256 }
  0x48   : > { %s1264_s3 = scalar_lea.hbm %s1718_s15, 128  ;;  %p1270_p6 = scmp.lt.u32.totalorder %s1718_s15, %s2095_s1 }
  0x49   : > { %p1265_p12 = scmp.ne.s32.totalorder %s1718_s15, %s1264_s3  ;;  %p1271_p10 = scmp.lt.u32.totalorder %s1269_s20, %s1264_s3 }
  0x4a   : > { %p1273_p5 = scmp.lt.u32.totalorder %s1264_s3, %s1718_s15 }
  0x4b   : > { %p1267_p1 = pnand %p1729_p0, %p1265_p12  ;;  %p1272_p3 = por %p1271_p10, %p1270_p6 }
  0x4d   : > { %p1268_p2 = pneg %p1267_p1  ;;  %p1274_p13 = por %p1273_p5, %p1272_p3 }
  0x4f   : > { %p1275_p7 = pnand %p1274_p13, %p1268_p2 }
  0x51   : > { %1278 = shalt.err (!%p1275_p7)
}
  0x52   : > { %s1279_s30 = scalar_lea.vmem %s1721_s24, 128  ;;  %s1521_s12 = smov [#allocation5]  }
  0x53   : > { %p1280_p12 = scmp.ne.s32.totalorder %s1721_s24, %s1279_s30  ;;  %s1284_s14 = sshll.u32 %s1521_s12, 4  ;;  %s1285_s14 = int_to_ptr.vmem [resolvable:$false] %s1284_s14 }
  0x54   : > { %s1286_s11 = scalar_lea.vmem %s1285_s14, 256  ;;  %p1287_p8 = scmp.lt.s32.totalorder %s1721_s24, %s1285_s14 }
  0x55   : > { %p1282_p1 = pnand %p1280_p12, %p1729_p0  ;;  %p1288_p11 = scmp.lt.s32.totalorder %s1286_s11, %s1279_s30 }
  0x57   : > { %p1283_p4 = pneg %p1282_p1  ;;  %p1289_p6 = por %p1288_p11, %p1287_p8 }
  0x59   : > { %p1290_p10 = pnand %p1289_p6, %p1283_p4 }
  0x5b   : > { %1293 = shalt.err (!%p1290_p10)
}
  0x5c   : > { %1167 = dma.hbm_to_vmem [thread:$0]  (!%p1709_p9), %s1718_s15, 128, %s1721_s24, %s1723_s13  }
  0x5d   : > { %s1522_s3 = smov [#allocation10]   ;;  %s1294_s12 = scalar_lea.hbm %s2047_s4, 256 }
  0x5e   : > { %s347_s20 = sshll.u32 %s1522_s3, 4  ;;  %p1295_p8 = scmp.ne.s32.totalorder %s2047_s4, %s1294_s12  ;;  %s348_s20 = int_to_ptr.vmem [resolvable:$true] %s347_s20 }
  0x5f   : > { %p2097_p4 = scmp.ne.s32.totalorder %s2088_s28, 0  ;;  %p1301_p2 = scmp.lt.u32.totalorder %s1294_s12, %s2047_s4 }
  0x61   : > { %p2098_p11 = pneg %p2097_p4 }
  0x63   : > { %p1297_p13 = pnand %p1295_p8, %p2098_p11 }
  0x65   : > { %p1298_p7 = pneg %p1297_p13 }
  0x67   : > { %p1303_p3 = pnand %p1301_p2, %p1298_p7 }
  0x69   : > { %1306 = shalt.err (!%p1303_p3)
}
  0x6a   : > { %s1307_s24 = scalar_lea.vmem %s348_s20, 256  ;;  %p2099_p12 = pmov %p2098_p11 }
  0x6b   : > { %p1308_p5 = scmp.ne.s32.totalorder %s348_s20, %s1307_s24  ;;  %p1315_p10 = scmp.lt.s32.totalorder %s348_s20, %s348_s20 }
  0x6c   : > { %p1316_p9 = scmp.lt.s32.totalorder %s1307_s24, %s1307_s24 }
  0x6d   : > { %p1310_p1 = pnand %p1308_p5, %p2099_p12 }
  0x6e   : > { %p1317_p0 = por %p1316_p9, %p1315_p10 }
  0x6f   : > { %p1311_p6 = pneg %p1310_p1 }
  0x71   : > { %p1318_p8 = pnand %p1317_p0, %p1311_p6 }
  0x73   : > { %1321 = shalt.err (!%p1318_p8)
}
  0x74   : > { %s2100_s1 = smov 4   ;;  %s2101_s9 = smov 64  }
  0x75   : > { %1160 = dma.hbm_to_vmem [thread:$0]  (!%p2097_p4), %s2047_s4, 256, %s348_s20, [#allocation9], %s2101_s9, %s2101_s9, %s2100_s1  }
  0x76   : > { %s1780_s14 = scalar_lea.hbm %s2043_s0, %s1703_s29  ;;  %s377_s28 = scalar_lea.vmem [#allocation2], %s1707_s17 }
  0x77   : > { %s384_s30 = sshll.u32 %s377_s28, 4  ;;  %s2102_s11 = sand.u32 1, %s1512_s19   ;;  %s385_s30 = int_to_ptr.vmem [resolvable:$true] %s384_s30 }
  0x78   : > { %s374_s24 = scalar_lea.sflag [#allocation3], %s2102_s11  ;;  %s1322_s15 = scalar_lea.hbm %s1780_s14, 128 }
  0x79   : > { %p1323_p9 = scmp.ne.s32.totalorder %s1780_s14, %s1322_s15  ;;  %p2103_p0 = scmp.ne.s32.totalorder %s2096_s16, 0 }
  0x7a   : > { %s1327_s9 = scalar_lea.hbm %s2043_s0, 256  ;;  %p1328_p4 = scmp.lt.u32.totalorder %s1780_s14, %s2043_s0 }
  0x7b   : > { %p1325_p11 = pnand %p1323_p9, %p2103_p0  ;;  %p1329_p7 = scmp.lt.u32.totalorder %s1327_s9, %s1322_s15 }
  0x7c   : > { %p1331_p3 = scmp.lt.u32.totalorder %s1322_s15, %s1780_s14 }
  0x7d   : > { %p1326_p13 = pneg %p1325_p11  ;;  %p1330_p2 = por %p1329_p7, %p1328_p4 }
  0x7f   : > { %p1332_p5 = por %p1331_p3, %p1330_p2 }
  0x81   : > { %p1333_p12 = pnand %p1332_p5, %p1326_p13 }
  0x83   : > { %1336 = shalt.err (!%p1333_p12)
}
  0x84   : > { %s1337_s12 = scalar_lea.vmem %s385_s30, 128  ;;  %s1523_s28 = smov [#allocation2]  }
  0x85   : > { %p1338_p1 = scmp.ne.s32.totalorder %s385_s30, %s1337_s12  ;;  %s1342_s11 = sshll.u32 %s1523_s28, 4  ;;  %s1343_s11 = int_to_ptr.vmem [resolvable:$false] %s1342_s11 }
  0x86   : > { %s1344_s20 = scalar_lea.vmem %s1343_s11, 256  ;;  %p1345_p8 = scmp.lt.s32.totalorder %s385_s30, %s1343_s11 }
  0x87   : > { %p1340_p6 = pnand %p1338_p1, %p2103_p0  ;;  %p1346_p9 = scmp.lt.s32.totalorder %s1344_s20, %s1337_s12 }
  0x89   : > { %p1341_p10 = pneg %p1340_p6  ;;  %p1347_p11 = por %p1346_p9, %p1345_p8 }
  0x8b   : > { %p1348_p4 = pnand %p1347_p11, %p1341_p10 }
  0x8d   : > { %1351 = shalt.err (!%p1348_p4)
}
  0x8e   : > { %p2104_p7 = scmp.ne.s32.totalorder %s2094_s27, 0  ;;  %s1806_s9 = scalar_lea.hbm %s2045_s2, %s1703_s29 }
  0x8f   : > { %s413_s3 = scalar_lea.vmem [#allocation7], %s1707_s17  ;;  %s1352_s12 = scalar_lea.hbm %s1806_s9, 128 }
  0x90   : > { %1164 = dma.hbm_to_vmem [thread:$0]  (!%p2104_p7), %s1780_s14, 128, %s385_s30, %s374_s24  }
  0x91   : > { %s420_s22 = sshll.u32 %s413_s3, 4  ;;  %p1353_p13 = scmp.ne.s32.totalorder %s1806_s9, %s1352_s12  ;;  %s421_s22 = int_to_ptr.vmem [resolvable:$true] %s420_s22 }
  0x92   : > { %s1357_s14 = scalar_lea.hbm %s2045_s2, 256  ;;  %p1358_p5 = scmp.lt.u32.totalorder %s1806_s9, %s2045_s2 }
  0x93   : > { %p1355_p2 = pnand %p1353_p13, %p2103_p0  ;;  %p1359_p12 = scmp.lt.u32.totalorder %s1357_s14, %s1352_s12 }
  0x94   : > { %p1361_p6 = scmp.lt.u32.totalorder %s1352_s12, %s1806_s9 }
  0x95   : > { %p1356_p3 = pneg %p1355_p2  ;;  %p1360_p1 = por %p1359_p12, %p1358_p5 }
  0x97   : > { %p1362_p10 = por %p1361_p6, %p1360_p1 }
  0x99   : > { %p1363_p8 = pnand %p1362_p10, %p1356_p3 }
  0x9b   : > { %1366 = shalt.err (!%p1363_p8)
}
  0x9c   : > { %s1367_s17 = scalar_lea.vmem %s421_s22, 128  ;;  %s1524_s29 = smov [#allocation7]  }
  0x9d   : > { %p1368_p9 = scmp.ne.s32.totalorder %s421_s22, %s1367_s17  ;;  %s1372_s20 = sshll.u32 %s1524_s29, 4  ;;  %s1373_s20 = int_to_ptr.vmem [resolvable:$false] %s1372_s20 }
  0x9e   : > { %s1374_s15 = scalar_lea.vmem %s1373_s20, 256  ;;  %p1375_p13 = scmp.lt.s32.totalorder %s421_s22, %s1373_s20 }
  0x9f   : > { %p1370_p11 = pnand %p1368_p9, %p2103_p0  ;;  %p1376_p2 = scmp.lt.s32.totalorder %s1374_s15, %s1367_s17 }
  0xa1   : > { %p1371_p4 = pneg %p1370_p11  ;;  %p1377_p7 = por %p1376_p2, %p1375_p13 }
  0xa3   : > { %p1378_p5 = pnand %p1377_p7, %p1371_p4 }
  0xa5   : > { %1381 = shalt.err (!%p1378_p5)
}
  0xa6   : > { %p2105_p12 = scmp.ne.s32.totalorder %s2094_s27, 0  ;;  %p2106_p3 = scmp.ne.s32.totalorder %s2087_s25, 0 }
  0xa7   : > { %s1830_s16 = sand.u32 (!%p2106_p3), 1, %s1508_s18   ;;  %p2107_p0 = scmp.ne.s32.totalorder (!%p2106_p3), %s2084_s23, 0 }
  0xa8   : > { %1170 = dma.hbm_to_vmem [thread:$0]  (!%p2105_p12), %s1806_s9, 128, %s421_s22, %s1723_s13  }
  0xa9   : > { %429 = sbr.rel (%p2106_p3) target bundleno = 590 (0x24e), region = 56  ;;  %s1833_s1 = sshll.u32 (!%p2106_p3), %s1830_s16, 3 }
  0xaa   : > { %s432_s3 = scalar_lea.sflag (!%p2106_p3), [#allocation3], %s1830_s16  ;;  %s435_s12 = scalar_lea.vmem (!%p2106_p3), [#allocation2], %s1833_s1 }
  0xb0   : > { %1483 = dma.done.wait (%p2107_p0), %s432_s3, 128  }
  0xb1   : > { %1485 = vsyncadd (%p2107_p0), %s432_s3, 4294967168  ;;  %s440_s25 = sand.u32 1, %s1616_s21   ;;  %s444_s27 = scalar_lea.vmem [#allocation5], %s1833_s1 }
  0xb2   : > { %s441_s13 = scalar_lea.sflag [#allocation6], %s440_s25 }
  0xb3   : > { %1487 = dma.done.wait (%p2107_p0), %s441_s13, 256  }
  0xb4   : > { %1489 = vsyncadd (%p2107_p0), %s441_s13, 4294967040  ;;  %s453_s9 = scalar_lea.vmem [#allocation7], %s1833_s1  ;;  %p2108_p7 = scmp.eq.s32.totalorder %s1616_s21, 0 }
  0xb6   : > { %1491 = dma.done.wait (%p2108_p7), [#allocation9], 512   ;;  %p2109_p1 = pmov %p2108_p7 }
  0xb7   : > { %v1525_v0 = vmov 0.0   ;;  %vm1526_vm0 = vmmov 0   ;;  %v1230_v1 = vld [vmem:[#allocation8] sm:$0xff]   ;;  %v1231_v2 = vld [vmem:[#allocation10] sm:$0xff]   ;;  %v1232_v3 = vld [vmem:[#allocation8 + $0x8] sm:$0xff]   ;;  %vm546_vm1 = vcmask 261120  }
  0xb8   : > { %1493 = vsyncadd (%p2109_p1), [#allocation9], 4294966784  ;;  %1110 = vmatprep.subr.bf16.mxu0 %v1525_v0  ;;  %1118 = vmatprep.subr.bf16.mxu1 %v1525_v0  ;;  %v1233_v4 = vld [vmem:[#allocation10 + $0x8] sm:$0xff]   ;;  %v591_v6 = vld [vmem:[%s444_s27] sm:$0xff]  ;;  %s1869_s24 = sshll.u32 %s1830_s16, 4  ;;  %vm728_vm2 = vcmask 60416  }
  0xb9   : > { %1114 = vmatprep.mubr.msk.bf16.mxu0 %vm1526_vm0, %v1525_v0  ;;  %1122 = vmatprep.mubr.msk.bf16.mxu1 %vm1526_vm0, %v1525_v0  ;;  %v521_v5 = vld [vmem:[%s435_s12] sm:$0xff]  ;;  %v592_v8 = vpack.c.bf16 %v591_v6, %v591_v6  ;;  %s1875_s20 = scalar_lea.vmem [#allocation12], %s1869_s24  ;;  %s1527_s15 = smov 104  }
  0xba   : > { %1111 = vmatpush3.bf16.msra.mxu0 %v1230_v1  ;;  %1119 = vmatpush3.bf16.msra.mxu1 %v1231_v2  ;;  %v522_v7 = vpack.c.bf16 %v521_v5, %v521_v5  ;;  %v1234_v9 = vld [vmem:[%s2048_s5] sm:$0xff]   ;;  %v1235_v10 = vld [vmem:[%s2048_s5 + $0x8] sm:$0xff]   ;;  %s1528_s1 = smov 120   ;;  %s1883_s13 = scalar_lea.vmem [#allocation11], %s1869_s24 }
  0xbb   : > { %1112 = vmatprep.subr.bf16.mxu0 %v1525_v0  ;;  %1120 = vmatprep.subr.bf16.mxu1 %v1525_v0  ;;  %v659_v11 = vld [vmem:[%s453_s9] sm:$0xff]  ;;  %s1529_s27 = smov 112   ;;  %s1888_s9 = scalar_lea.vmem [#allocation14], %s1869_s24 }
  0xbc   : > { %v660_v12 = vpack.c.bf16 %v659_v11, %v659_v11  ;;  %v1060_v13 = vld [vmem:[%s2049_s6] ss:$0 sm:$0xff]  ;;  %s828_s23 = sshll.u32 %s1875_s20, 4  ;;  %s1894_s22 = sshll.u32 %s1616_s21, 8  ;;  %s1896_s23 = int_to_ptr.vmem [resolvable:$true] %s828_s23 }
  0xbd   : > { %v1064_v14 = vld [vmem:[%s2050_s7] ss:$0 sm:$0xff]  ;;  %s1906_s14 = scalar_lea.hbm %s2053_s10, %s1894_s22  ;;  %s1914_s30 = scalar_lea.sflag [#allocation13], %s440_s25 }
  0xbe   : > { %1113 = vmatpush3.bf16.msra.mxu0 %v1232_v3  ;;  %1121 = vmatpush3.bf16.msra.mxu1 %v1233_v4  ;;  %v1068_v28 = vld [vmem:[%s2051_s8] ss:$0 sm:$0xff]  ;;  %s1382_s24 = scalar_lea.vmem %s1896_s23, 256  ;;  %p2110_p10 = scmp.ne.s32.totalorder %s2093_s26, 0 }
  0xbf   : > { %1126 = vmatprep.subr.bf16.mxu0 %v1525_v0  ;;  %p1383_p6 = scmp.ne.s32.totalorder %s1896_s23, %s1382_s24  ;;  %s1530_s17 = smov [#allocation12]  }
  0xc0   : > { %s1386_s29 = sshll.u32 %s1530_s17, 4  ;;  %s1387_s29 = int_to_ptr.vmem [resolvable:$false] %s1386_s29 }
  0xc1   : > { %1115 = vmatmul.mubr.msk.bf16.vlgmr.msra.gmra.mrb[0].mxu0 %vm546_vm1, %v522_v7  ;;  %1123 = vmatmul.mubr.msk.bf16.vlgmr.msra.gmra.mrb[0].mxu1 %vm546_vm1, %v592_v8  ;;  %p1384_p8 = pnand %p1383_p6, %p2110_p10  ;;  %p1389_p11 = scmp.lt.s32.totalorder %s1896_s23, %s1387_s29 }
  0xc2   : > { %1127 = vmatpush3.bf16.msra.mxu0 %v1234_v9  ;;  %1130 = vmatprep.mubr.msk.bf16.mxu0 %vm1526_vm0, %v1525_v0 }
  0xc3   : > { %1128 = vmatprep.subr.bf16.mxu0 %v1525_v0  ;;  %p1385_p9 = pneg %p1384_p8 }
  0xc6   : > { %1129 = vmatpush3.bf16.msra.mxu0 %v1235_v10 }
  0xc9   : > { %1131 = vmatmul.mubr.msk.bf16.vlgmr.msra.gmra.mrb[4].mxu0 %vm546_vm1, %v660_v12 }
 0x194   : > { %v584_v15 = vpop.f32.mrb[0].mxu0  ;;  %v653_v17 = vpop.f32.mrb[0].mxu1 }
 0x195   : > { %v585_v16 = vadd.f32 %v1060_v13, %v584_v15  ;;  %v1116_v18 = vpop.f32.mrb[1].mxu0  ;;  %v654_v19 = vadd.f32 %v1064_v14, %v653_v17  ;;  %v1124_v20 = vpop.f32.mrb[1].mxu1 }
 0x196   : > { %v587_v21 = vpop.f32.mrb[2].mxu0  ;;  %v656_v23 = vpop.f32.mrb[2].mxu1 }
 0x197   : > { %v590_v22 = vmul.f32 0.35355338, %v585_v16  ;;  %v1117_v24 = vpop.f32.mrb[3].mxu0  ;;  %v730_v25 = vpack.c.bf16 %v654_v19, %v654_v19  ;;  %v1125_v26 = vpop.f32.mrb[3].mxu1 }
 0x199   : > { %v727_v27 = vpack.c.bf16 %v590_v22, %v590_v22  ;;  %731 = vst.msk [vmem:[%s1875_s20] sm:$0xf] %vm728_vm2, %v730_v25  ;;  %778 = vrot.lane.b32.xlu1 %v730_v25, %s1527_s15  ;;  %745 = vrot.lane.b32.xlu0 %v730_v25, %s1528_s1 }
 0x19b   : > { %729 = vst.msk [vmem:[%s1883_s13] sm:$0xf] %vm728_vm2, %v727_v27 }
 0x19c   : > { %v721_v29 = vpop.f32.mrb[4].mxu0 }
 0x19d   : > { %v722_v30 = vadd.f32 %v1068_v28, %v721_v29  ;;  %v1132_v31 = vpop.f32.mrb[5].mxu0  ;;  %763 = vrot.lane.b32.xlu0 %v730_v25, %s1529_s27  ;;  %737 = vrot.lane.b32.xlu1 %v727_v27, %s1528_s1 }
 0x19e   : > { %v724_v32 = vpop.f32.mrb[6].mxu0 }
 0x19f   : > { %v732_v33 = vpack.c.bf16 %v722_v30, %v722_v30  ;;  %v1133_v34 = vpop.f32.mrb[7].mxu0 }
 0x1a1   : > { %733 = vst.msk [vmem:[%s1888_s9] sm:$0xf] %vm728_vm2, %v732_v33  ;;  %758 = vrot.lane.b32.xlu1 %v727_v27, %s1529_s27  ;;  %753 = vrot.lane.b32.xlu0 %v732_v33, %s1528_s1 }
 0x1a5   : > { %773 = vrot.lane.b32.xlu1 %v727_v27, %s1527_s15  ;;  %768 = vrot.lane.b32.xlu0 %v732_v33, %s1529_s27 }
 0x1a9   : > { %783 = vrot.lane.b32.xlu0 %v732_v33, %s1527_s15  ;;  %s1388_s15 = scalar_lea.vmem %s1387_s29, 512 }
 0x1aa   : > { %p1390_p4 = scmp.lt.s32.totalorder %s1388_s15, %s1382_s24 }
 0x1ac   : > { %p1391_p13 = por %p1390_p4, %p1389_p11 }
 0x1ae   : > { %p1392_p2 = pnand %p1391_p13, %p1385_p9 }
 0x20b   : > { %v779_v35 = vpop.permute.xlu1 %778  ;;  %v746_v36 = vpop.permute.xlu0 %745 }
 0x20c   : > { %1082 = vst.msk [vmem:[%s1875_s20 + $0xc] sm:$0xf] %vm728_vm2, %v779_v35  ;;  %1075 = vst.msk [vmem:[%s1875_s20 + $0x4] sm:$0xf] %vm728_vm2, %v746_v36 }
 0x20f   : > { %v764_v37 = vpop.permute.xlu0 %763  ;;  %v738_v38 = vpop.permute.xlu1 %737 }
 0x210   : > { %1079 = vst.msk [vmem:[%s1875_s20 + $0x8] sm:$0xf] %vm728_vm2, %v764_v37  ;;  %1073 = vst.msk [vmem:[%s1883_s13 + $0x4] sm:$0xf] %vm728_vm2, %v738_v38 }
 0x211   : > { %1395 = shalt.err (!%p1392_p2)
}
 0x212   : > { %s1396_s21 = scalar_lea.hbm %s1906_s14, 256  ;;  %s1400_s1 = scalar_lea.hbm %s2053_s10, 512 }
 0x213   : > { %p1397_p5 = scmp.ne.s32.totalorder %s1906_s14, %s1396_s21  ;;  %p1401_p0 = scmp.lt.u32.totalorder %s1906_s14, %s2053_s10 }
 0x214   : > { %p1402_p7 = scmp.lt.u32.totalorder %s1400_s1, %s1396_s21  ;;  %p1404_p6 = scmp.lt.u32.totalorder %s1396_s21, %s1906_s14 }
 0x215   : > { %p1398_p12 = pnand %p1397_p5, %p2110_p10 }
 0x216   : > { %p1403_p1 = por %p1402_p7, %p1401_p0 }
 0x217   : > { %p1399_p3 = pneg %p1398_p12 }
 0x218   : > { %p1405_p8 = por %p1404_p6, %p1403_p1 }
 0x21a   : > { %p1406_p9 = pnand %p1405_p8, %p1399_p3 }
 0x21c   : > { %1409 = shalt.err (!%p1406_p9)
}
 0x21d   : > { %s1531_s27 = smov 64   ;;  %s1532_s28 = smov 4   ;;  %v759_v39 = vpop.permute.xlu1 %758  ;;  %v754_v40 = vpop.permute.xlu0 %753 }
 0x21e   : > { %1149 = dma.vmem_to_hbm [thread:$0]  (%p2110_p10), %s1896_s23, 256, %s1906_s14, %s1914_s30, %s1531_s27, %s1531_s27, %s1532_s28  }
 0x21f   : > { %s812_s11 = sshll.u32 %s1883_s13, 4  ;;  %1078 = vst.msk [vmem:[%s1883_s13 + $0x8] sm:$0xf] %vm728_vm2, %v759_v39  ;;  %1077 = vst.msk [vmem:[%s1888_s9 + $0x4] sm:$0xf] %vm728_vm2, %v754_v40  ;;  %s2111_s29 = sld [smem:[#allocation27_spill]]  ;;  %s1946_s11 = int_to_ptr.vmem [resolvable:$true] %s812_s11 }
 0x220   : > { %s844_s21 = sshll.u32 %s1888_s9, 4  ;;  %s789_s23 = scalar_lea.sflag [#allocation4], %s1830_s16  ;;  %s1988_s21 = int_to_ptr.vmem [resolvable:$true] %s844_s21 }
 0x221   : > { %v774_v41 = vpop.permute.xlu1 %773  ;;  %v769_v42 = vpop.permute.xlu0 %768  ;;  %s1410_s14 = scalar_lea.vmem %s1946_s11, 256  ;;  %s1533_s25 = smov [#allocation11]  }
 0x222   : > { %1081 = vst.msk [vmem:[%s1883_s13 + $0xc] sm:$0xf] %vm728_vm2, %v774_v41  ;;  %1080 = vst.msk [vmem:[%s1888_s9 + $0x8] sm:$0xf] %vm728_vm2, %v769_v42  ;;  %p1411_p11 = scmp.ne.s32.totalorder %s1946_s11, %s1410_s14  ;;  %s1414_s20 = sshll.u32 %s1533_s25, 4  ;;  %s1415_s20 = int_to_ptr.vmem [resolvable:$false] %s1414_s20 }
 0x223   : > { %s1416_s1 = scalar_lea.vmem %s1415_s20, 512  ;;  %p1417_p2 = scmp.lt.s32.totalorder %s1946_s11, %s1415_s20 }
 0x224   : > { %p1412_p4 = pnand %p1411_p11, %p2110_p10  ;;  %p1418_p5 = scmp.lt.s32.totalorder %s1416_s1, %s1410_s14 }
 0x225   : > { %s1952_s15 = scalar_lea.hbm %s2111_s29, %s1894_s22 }
 0x226   : > { %p1413_p13 = pneg %p1412_p4  ;;  %p1419_p12 = por %p1418_p5, %p1417_p2 }
 0x228   : > { %p1420_p3 = pnand %p1419_p12, %p1413_p13 }
 0x22a   : > { %1423 = shalt.err (!%p1420_p3)
}
 0x22b   : > { %s1424_s13 = scalar_lea.hbm %s1952_s15, 256  ;;  %s1428_s24 = scalar_lea.hbm %s2111_s29, 512 }
 0x22c   : > { %p1425_p0 = scmp.ne.s32.totalorder %s1952_s15, %s1424_s13  ;;  %p1429_p6 = scmp.lt.u32.totalorder %s1952_s15, %s2111_s29 }
 0x22d   : > { %p1430_p8 = scmp.lt.u32.totalorder %s1428_s24, %s1424_s13  ;;  %p1432_p11 = scmp.lt.u32.totalorder %s1424_s13, %s1952_s15 }
 0x22e   : > { %p1426_p7 = pnand %p1425_p0, %p2110_p10 }
 0x22f   : > { %p1431_p9 = por %p1430_p8, %p1429_p6 }
 0x230   : > { %p1427_p1 = pneg %p1426_p7 }
 0x231   : > { %p1433_p4 = por %p1432_p11, %p1431_p9 }
 0x233   : > { %p1434_p13 = pnand %p1433_p4, %p1427_p1 }
 0x235   : > { %1437 = shalt.err (!%p1434_p13)
}
 0x236   : > { %1148 = dma.vmem_to_hbm [thread:$0]  (%p2110_p10), %s1946_s11, 256, %s1952_s15, %s789_s23, %s1531_s27, %s1531_s27, %s1532_s28   ;;  %v784_v43 = vpop.permute.xlu0 %783 }
 0x237   : > { %s2112_s1 = sld [smem:[#allocation28_spill]]  ;;  %1083 = vst.msk [vmem:[%s1888_s9 + $0xc] sm:$0xf] %vm728_vm2, %v784_v43  ;;  %s1438_s16 = scalar_lea.vmem %s1988_s21, 256 }
 0x238   : > { %p1439_p2 = scmp.ne.s32.totalorder %s1988_s21, %s1438_s16  ;;  %s1534_s11 = smov [#allocation14]  }
 0x239   : > { %s1442_s15 = sshll.u32 %s1534_s11, 4  ;;  %s1443_s15 = int_to_ptr.vmem [resolvable:$false] %s1442_s15 }
 0x23a   : > { %p1440_p5 = pnand %p1439_p2, %p2110_p10  ;;  %s1444_s23 = scalar_lea.vmem %s1443_s15, 512 }
 0x23b   : > { %p1445_p3 = scmp.lt.s32.totalorder %s1988_s21, %s1443_s15  ;;  %p1446_p0 = scmp.lt.s32.totalorder %s1444_s23, %s1438_s16 }
 0x23c   : > { %p1441_p12 = pneg %p1440_p5 }
 0x23d   : > { %s1994_s13 = scalar_lea.hbm %s2112_s1, %s1894_s22  ;;  %p1447_p7 = por %p1446_p0, %p1445_p3 }
 0x23f   : > { %p1448_p1 = pnand %p1447_p7, %p1441_p12 }
 0x241   : > { %1451 = shalt.err (!%p1448_p1)
}
 0x242   : > { %s1452_s9 = scalar_lea.hbm %s1994_s13, 256  ;;  %s1456_s12 = scalar_lea.hbm %s2112_s1, 512 }
 0x243   : > { %p1453_p6 = scmp.ne.s32.totalorder %s1994_s13, %s1452_s9  ;;  %p1457_p11 = scmp.lt.u32.totalorder %s1994_s13, %s2112_s1 }
 0x244   : > { %p1458_p4 = scmp.lt.u32.totalorder %s1456_s12, %s1452_s9  ;;  %p1460_p2 = scmp.lt.u32.totalorder %s1452_s9, %s1994_s13 }
 0x245   : > { %p1454_p8 = pnand %p1453_p6, %p2110_p10 }
 0x246   : > { %p1459_p13 = por %p1458_p4, %p1457_p11 }
 0x247   : > { %p1455_p9 = pneg %p1454_p8 }
 0x248   : > { %p1461_p5 = por %p1460_p2, %p1459_p13 }
 0x24a   : > { %p1462_p12 = pnand %p1461_p5, %p1455_p9 }
 0x24c   : > { %1465 = shalt.err (!%p1462_p12)
}
 0x24d   : > { %1150 = dma.vmem_to_hbm [thread:$0]  (%p2110_p10), %s1988_s21, 256, %s1994_s13, %s1914_s30, %s1531_s27, %s1531_s27, %s1532_s28  }
 0x24e PF: > { %s2113_s25 = sld [smem:[#allocation20_spill]]  ;;  %s2114_s14 = sld [smem:[#allocation22_spill]] }
 0x24f   : > { %s2115_s20 = sld [smem:[#allocation21_spill]] }
 0x254   : > { %s859_s16 = sand.u32 1, %s2113_s25   ;;  %p2116_p3 = scmp.ne.s32.totalorder %s2114_s14, 0 }
 0x255   : > { %p2117_p0 = scmp.ge.s32.totalorder %s2115_s20, 2  ;;  %s860_s11 = scalar_lea.sflag [#allocation4], %s859_s16 }
 0x257   : > { %p1172_p7 = pnand %p2117_p0, %p2116_p3 }
 0x259   : > { %1495 = dma.done.wait (!%p1172_p7), %s860_s11, 256  }
 0x25a   : > { %1497 = vsyncadd (!%p1172_p7), %s860_s11, 4294967040  ;;  %s2118_s26 = sadd.s32 4294967294, %s2115_s20  }
 0x25b   : > { %s868_s15 = sand.u32 1, %s2118_s26  }
 0x25c   : > { %s869_s23 = scalar_lea.sflag [#allocation13], %s868_s15 }
 0x25d   : > { %1499 = dma.done.wait (!%p1172_p7), %s869_s23, 512  }
 0x25e   : > { %1501 = vsyncadd (!%p1172_p7), %s869_s23, 4294966784  ;;  %s2119_s20 = sld [smem:[#allocation23_spill]]  ;;  %s2120_s30 = sld [smem:[#allocation24_spill]] }
 0x25f   : > { %s2121_s17 = smov %s1508_s18  ;;  %s2122_s18 = smov %s1512_s19 }
 0x264   : > { %p32_p10 = scmp.ge.s32.totalorder %s2119_s20, 4   ;;  %s2123_s19 = smov %s2120_s30 }
 0x266   :  { %34 = sbr.rel (!%p32_p10) target bundleno = 15 (0xf), region = 174 }
 0x26d   :  { %883 = vsyncpa [#allocation3], 1 }
 0x26e   :  { %885 = vsyncpa [#allocation3 + $0x1], 1 }
 0x26f   :  { %886 = vsyncpa [#allocation6], 1 }
 0x270   :  { %888 = vsyncpa [#allocation6 + $0x1], 1 }
 0x271   :  { %889 = vsyncpa [#allocation9], 1 }
 0x272   :  { %890 = vsyncpa [#allocation4], 1 }
 0x273   :  { %892 = vsyncpa [#allocation4 + $0x1], 1 }
 0x274   :  { %893 = vsyncpa [#allocation13], 1 }
 0x275   :  { %895 = vsyncpa [#allocation13 + $0x1], 1 }

</bundles_post_ra>
